<compile_context>
chip_gen: v7x
topology: tpu7x:2x2x1
jax: 0.10.0
libtpu: 0.0.40
codegen_flags: <defaults>
</compile_context>

<pallas_src>
import math

import numpy as np
import jax
import jax.numpy as jnp
from jax.experimental import pallas as pl
from jax.experimental.pallas import tpu as pltpu


# ----------------------------------------------------------------------------
# Host-side (deterministic) parameter construction -- mirrors __init__.
# ----------------------------------------------------------------------------
NUM_FEATURE_MAPS = 6
_S_MIN, _S_MAX = 0.2, 0.9
_SCALES = [
    _S_MIN + (_S_MAX - _S_MIN) * (k / (NUM_FEATURE_MAPS - 1))
    for k in range(NUM_FEATURE_MAPS)
] + [1.0]

_ASPECT_RATIOS = [
    np.array([1.0, 1.0, 2.0, 1.0 / 2.0], dtype=np.float32),
    np.array([1.0, 1.0, 2.0, 3.0, 1.0 / 2.0, 1.0 / 3.0], dtype=np.float32),
    np.array([1.0, 1.0, 2.0, 3.0, 1.0 / 2.0, 1.0 / 3.0], dtype=np.float32),
    np.array([1.0, 1.0, 2.0, 3.0, 1.0 / 2.0, 1.0 / 3.0], dtype=np.float32),
    np.array([1.0, 1.0, 2.0, 1.0 / 2.0], dtype=np.float32),
    np.array([1.0, 1.0, 2.0, 1.0 / 2.0], dtype=np.float32),
]


def _generate_wh_pairs():
    """Same math as AnchorBoxGenerator._generate_wh_pairs, in float32 numpy."""
    wh_pairs = []
    for k in range(NUM_FEATURE_MAPS):
        s_k = _SCALES[k]
        s_prime_k = math.sqrt(_SCALES[k] * _SCALES[k + 1])
        ar = _ASPECT_RATIOS[k]
        scales = np.array([s_prime_k] + [s_k] * (len(ar) - 1), dtype=np.float32)
        widths = scales * np.sqrt(ar)
        heights = scales / np.sqrt(ar)
        wh_pairs.append(np.stack((widths, heights), axis=-1))  # (P_k, 2)
    return wh_pairs


_WH_PAIRS = _generate_wh_pairs()


def _build_anchor_slab(feature_map_sizes):
    """Host-side construction of the (total_anchors, 4) slab.

    Mirrors AnchorBoxGenerator._generate_anchor_boxes exactly:
    pixel-major (y*W + x) order, wh-pair index fastest, columns (cx, cy, w, h).
    """
    boxes = []
    for k, (H, W) in enumerate(feature_map_sizes):
        H, W = int(H), int(W)
        offs_x = (np.arange(W, dtype=np.float32) + 0.5) / np.float32(W)
        offs_y = (np.arange(H, dtype=np.float32) + 0.5) / np.float32(H)
        oy, ox = np.meshgrid(offs_y, offs_x, indexing="ij")
        centers = np.stack([ox.reshape(-1), oy.reshape(-1)], axis=-1)  # (H*W, 2)
        P = _WH_PAIRS[k].shape[0]
        centers = np.repeat(centers, P, axis=0)                        # (H*W*P, 2)
        wh = np.tile(_WH_PAIRS[k], (H * W, 1))                         # (H*W*P, 2)
        boxes.append(np.concatenate([centers, wh], axis=1).astype(np.float32))
    return np.concatenate(boxes, axis=0)                               # (total, 4)


# ----------------------------------------------------------------------------
# Pallas kernel: pure replicate / store.
# ----------------------------------------------------------------------------
def _replicate_kernel(anchors_ref, out_ref):
    # anchors_ref: (1, l_tile) lane-dense constant chunk in VMEM.
    # out_ref    : (b_tile, l_tile) output block -> sublane broadcast + store.
    out_ref[...] = jnp.broadcast_to(anchors_ref[...], out_ref.shape)


_OUT_BLOCK_BUDGET_BYTES = 8 * 1024 * 1024   # one output block (Pallas double-buffers it)
_PALLAS_MIN_OUT_BYTES = 1 * 1024 * 1024     # below this, plain XLA broadcast wins


def _plan_tiling(batch, lane_width):
    """Pick (b_tile, l_tile, grid): layout-legal, VMEM-safe, and with >= 2
    parallel grid steps whenever the problem is big enough (v7x has 2 TCs)."""
    row_bytes = lane_width * 4
    max_rows = max(1, _OUT_BLOCK_BUDGET_BYTES // row_bytes)

    if batch <= max_rows:
        b_tile = batch                          # full-dim block: always legal
    else:
        b_tile = max(8, (max_rows // 8) * 8)    # multiple-of-8 tile under budget
    n_b = pl.cdiv(batch, b_tile)

    l_tile = lane_width
    if n_b == 1:
        if batch > 8:
            # Split the batch axis into two tiles (first one a multiple of 8).
            b_tile = 8 * pl.cdiv(batch, 16)
            n_b = pl.cdiv(batch, b_tile)
        elif lane_width >= 256:
            # Split the lane axis into two 128-aligned chunks instead.
            l_tile = 128 * pl.cdiv(lane_width, 256)
    n_l = pl.cdiv(lane_width, l_tile)
    return b_tile, l_tile, (n_b, n_l)


def anchor_box_generator(batch_size, feature_map_sizes, *, use_pallas=None):
    """Pallas equivalent of AnchorBoxGenerator.forward -> (batch, total, 4)."""
    if len(feature_map_sizes) != NUM_FEATURE_MAPS:
        raise ValueError(
            f"Observed {len(feature_map_sizes)} feature map sizes, but "
            f"require {NUM_FEATURE_MAPS}"
        )

    slab = _build_anchor_slab(feature_map_sizes)          # (total, 4) float32
    total = slab.shape[0]
    lane_width = total * 4
    batch_size = int(batch_size)
    out_bytes = batch_size * lane_width * 4

    if use_pallas is None:
        use_pallas = out_bytes >= _PALLAS_MIN_OUT_BYTES
    if not use_pallas:
        # Tiny workload: pallas_call fixed overhead dominates -> let XLA
        # broadcast / fuse the host-built constant.
        return jnp.broadcast_to(jnp.asarray(slab)[None], (batch_size, total, 4))

    slab_flat = jnp.asarray(slab.reshape(1, lane_width))  # lane-dense constant
    b_tile, l_tile, grid = _plan_tiling(batch_size, lane_width)

    out_block_bytes = b_tile * l_tile * 4
    in_block_bytes = l_tile * 4
    vmem_limit = 2 * (out_block_bytes + in_block_bytes) + (2 << 20)
    vmem_limit = int(min(max(vmem_limit, 8 << 20), 48 << 20))  # v7x-safe cap

    out_flat = pl.pallas_call(
        _replicate_kernel,
        out_shape=jax.ShapeDtypeStruct((batch_size, lane_width), jnp.float32),
        grid=grid,
        in_specs=[pl.BlockSpec((1, l_tile), lambda b, l: (0, l))],
        out_specs=pl.BlockSpec((b_tile, l_tile), lambda b, l: (b, l)),
        compiler_params=pltpu.CompilerParams(
            dimension_semantics=("parallel", "parallel"),
            vmem_limit_bytes=vmem_limit,
        ),
        cost_estimate=pl.CostEstimate(
            flops=0,
            transcendentals=0,
            bytes_accessed=out_bytes + grid[0] * lane_width * 4,
        ),
    )(slab_flat)

    # Row-major reshape back to (batch, total, 4) is free.
    return out_flat.reshape(batch_size, total, 4)


# ----------------------------------------------------------------------------
# Pure-numpy reference (mirrors the torch forward) for correctness checking.
# ----------------------------------------------------------------------------
def _reference(batch_size, feature_map_sizes):
    anchors = _build_anchor_slab(feature_map_sizes)
    return np.broadcast_to(anchors[None], (batch_size,) + anchors.shape)


if __name__ == "__main__":
    # PRNGKey required by the harness; forward has no tensor inputs.
    _ = jax.random.PRNGKey(0)

    small_fms = [(8, 8), (4, 4), (2, 2), (2, 2), (1, 1), (1, 1)]
    ssd_fms = [(38, 38), (19, 19), (10, 10), (5, 5), (3, 3), (1, 1)]

    cases = [
        # (batch, feature_map_sizes, use_pallas)
        (2, small_fms, True),    # Pallas: lane-split grid (>=2 steps, tiny batch)
        (10, small_fms, True),   # Pallas: batch-split grid + masked partial block
        (4, ssd_fms, True),      # Pallas: realistic SSD300 anchor count (8732)
        (2, small_fms, None),    # auto dispatch -> XLA broadcast fast path
    ]
    for batch, fms, force in cases:
        out = anchor_box_generator(batch, fms, use_pallas=force)
        out = jax.block_until_ready(out)
        ref = _reference(batch, fms)
        assert out.shape == ref.shape, (out.shape, ref.shape)
        np.testing.assert_allclose(np.asarray(out), ref, rtol=1e-6, atol=1e-6)

    print("KERNEL_OK")
</pallas_src>

<mosaic_0001>
module attributes {stable_mosaic.version = 11 : i64} {
  func.func @_replicate_kernel(%arg0: i32, %arg1: i32, %arg2: memref<1x896xf32, #tpu.memory_space<vmem>>, %arg3: memref<2x896xf32, #tpu.memory_space<vmem>>) attributes {dimension_semantics = [#tpu.dimension_semantics<parallel>, #tpu.dimension_semantics<parallel>], iteration_bounds = array<i64: 1, 2>, scalar_prefetch = 0 : i64, scratch_operands = 0 : i64, tpu.core_type = #tpu.core_type<tc>, window_params = [{transform_indices = @transform_0, window_bounds = array<i64: 1, 896>}, {transform_indices = @transform_1, window_bounds = array<i64: 2, 896>}]} {
    %c0 = arith.constant 0 : index
    %c0_0 = arith.constant 0 : index
    %0 = vector.load %arg2[%c0, %c0_0] : memref<1x896xf32, #tpu.memory_space<vmem>>, vector<1x896xf32>
    %1 = vector.shape_cast %0 : vector<1x896xf32> to vector<1x896xf32>
    %2 = vector.broadcast %1 : vector<1x896xf32> to vector<2x896xf32>
    %c0_1 = arith.constant 0 : index
    %c0_2 = arith.constant 0 : index
    %3 = vector.load %arg3[%c0_1, %c0_2] : memref<2x896xf32, #tpu.memory_space<vmem>>, vector<2x896xf32>
    tpu.vector_store %arg3[%c0_1, %c0_2], %2 {strides = array<i32>} : memref<2x896xf32, #tpu.memory_space<vmem>>, vector<2x896xf32>,
    return
  }
  func.func @transform_0(%arg0: i32, %arg1: i32) -> (i32, i32) {
    %c0_i32 = arith.constant 0 : i32
    %c0_i32_0 = arith.constant 0 : i32
    return %c0_i32, %arg1 : i32, i32
  }
  func.func @transform_1(%arg0: i32, %arg1: i32) -> (i32, i32) {
    %c0_i32 = arith.constant 0 : i32
    return %arg0, %arg1 : i32, i32
  }
}

</mosaic_0001>

<bundles_post_ra>
// kernel: tpu_custom_call.1
= control target key start
LH: loop header
LB: loop body
LE: loop exit
PB: predicated region body
PF: predicated region fallthrough
CT: control target
= control target key end

     0   :  { %6 = vsyncpa [#allocation3], 0  ;;  %s704_s0 = inlined_call_operand.hbm [shape: f32[1,1632], index: 0, kind: input, shape index: {}]   ;;  %s705_s1 = inlined_call_operand.hbm [shape: f32[2,1632], index: 1, kind: output, shape index: {}]  }
   0x1   :  { %8 = vsyncpa [#allocation3 + $0x1], 0 }
   0x2   :  { %9 = vsyncpa [#allocation4], 0 }
   0x3   :  { %11 = vsyncpa [#allocation4 + $0x1], 0  ;;  %s534_s6 = smov 0   ;;  %s536_s7 = smov 0  }
   0x4   :  { %s538_s8 = smov 0   ;;  %s540_s9 = smov 0  }
   0x5   :  { %s542_s10 = smov 0   ;;  %s544_s11 = smov 0  }
   0x6 LB: > { %s333_s12 = sadd.s32 4294967295, %s519_s11   ;;  %s334_s13 = sadd.s32 4294967294, %s519_s11   ;;  %s519_s11 = sphi %s544_s11, %s17_s11   ;;  %s515_s10 = sphi %s542_s10, %s719_s10   ;;  %s511_s9 = sphi %s540_s9, %s718_s9   ;;  %s507_s8 = sphi %s538_s8, %s717_s8   ;;  %s503_s7 = sphi %s536_s7, %s716_s7   ;;  %s499_s6 = sphi %s534_s6, %s715_s6  }
   0x7   : > { %s26_s14 = sadd.s32 1, %s515_s10  ;;  %s36_s15 = sadd.s32 1, %s507_s8 }
   0x8   : > { %p27_p0 = scmp.ge.s32.totalorder %s26_s14, 2  ;;  %p43_p1 = scmp.ne.s32.totalorder %s507_s8, %s503_s7 }
   0x9   : > { %p44_p2 = scmp.eq.s32.totalorder %s519_s11, 0  ;;  %p49_p3 = scmp.ne.s32.totalorder %s503_s7, %s499_s6 }
   0xa   : > { %s721_s14 = smov (%p27_p0, %s26_s14), 0  ;;  %p50_p5 = scmp.eq.s32.totalorder %s333_s12, 0 }
   0xb   : > { %p45_p4 = por %p44_p2, %p43_p1  ;;  %s33_s16 = ssub.s32 %s515_s10, %s721_s14 }
   0xc   : > { %p75_p6 = scmp.eq.s32.totalorder %s333_s12, 1  ;;  %p34_p7 = scmp.eq.s32.totalorder %s33_s16, 0 }
   0xd   : > { %p577_p8 = por %p50_p5, %p49_p3  ;;  %p81_p10 = scmp.eq.s32.totalorder %s334_s13, 1 }
   0xe   : > { %p581_p9 = por %p75_p6, %p43_p1  ;;  %p706_p12 = scmp.ge.s32.totalorder %s519_s11, 2 }
   0xf   : > { %s708_s17 = scalar_select %p577_p8, 1, 0 }
  0x10   : > { %s709_s18 = scalar_select %p581_p9, 1, 0 }
  0x11   : > { %s586_s19 = scalar_select %p34_p7, %s507_s8, %s36_s15  }
  0x12   : > { %p588_p11 = por %p81_p10, %p49_p3  ;;  %97 = sbr.rel (%p706_p12) target bundleno = 59 (0x3b), region = 16 }
  0x14   : > { %s710_s20 = scalar_select %p588_p11, 1, 0 }
  0x19   : > { %100 = sbr.rel (!%p45_p4) target bundleno = 59 (0x3b), region = 20  ;;  %s101_s21 = sand.u32 (%p45_p4), 1, %s507_s8  }
  0x1a   : > { %s106_s22 = smul.u32 (%p45_p4), 7, %s515_s10  ;;  %s600_s27 = scalar_lea.sflag (%p45_p4), [#allocation3], %s101_s21 }
  0x1b   : > { %s350_s23 = smul.u32 (%p45_p4), 7, %s101_s21 }
  0x1c   : > { %s107_s24 = ssub.s32 (%p45_p4), 13, %s106_s22 }
  0x1d   : > { %p108_p13 = scmp.lt.s32.totalorder (%p45_p4), %s107_s24, 7  ;;  %s105_s28 = scalar_lea.vmem (%p45_p4), [#allocation2], %s350_s23 }
  0x20   : > { %s723_s24 = smov (!%p108_p13, %s107_s24), 7 }
  0x21   : > { %s597_s25 = sshll.u32 %s723_s24, 4 }
  0x22   : > { %s112_s26 = ssub.s32 112, %s597_s25 }
  0x23   : > { %113 = vsyncadd %s600_s27, %s112_s26  ;;  %p338_p0 = scmp.ne.s32.totalorder %s597_s25, 0  ;;  %s348_s29 = smul.u32 112, %s515_s10 }
  0x24   : > { %s118_s30 = sshll.u32 %s105_s28, 4  ;;  %s413_s15 = scalar_lea.hbm %s704_s0, 208  ;;  %s119_s30 = int_to_ptr.vmem [resolvable:$true] %s118_s30 }
  0x25   : > { %s608_s4 = scalar_lea.hbm %s704_s0, %s348_s29 }
  0x26   : > { %s409_s5 = scalar_lea.hbm %s608_s4, %s597_s25  ;;  %p414_p4 = scmp.lt.u32.totalorder %s608_s4, %s704_s0 }
  0x27   : > { %p410_p1 = scmp.ne.s32.totalorder %s608_s4, %s409_s5  ;;  %p415_p5 = scmp.lt.u32.totalorder %s413_s15, %s409_s5 }
  0x28   : > { %p417_p7 = scmp.lt.u32.totalorder %s409_s5, %s608_s4 }
  0x29   : > { %p411_p2 = pnand %p410_p1, %p338_p0  ;;  %p416_p6 = por %p415_p5, %p414_p4 }
  0x2b   : > { %p412_p3 = pneg %p411_p2  ;;  %p418_p10 = por %p417_p7, %p416_p6 }
  0x2d   : > { %p419_p13 = pnand %p418_p10, %p412_p3 }
  0x2f   : > { %422 = shalt.err (!%p419_p13)
}
  0x30   : > { %s423_s22 = scalar_lea.vmem %s119_s30, %s597_s25  ;;  %s521_s23 = smov [#allocation2]  }
  0x31   : > { %p424_p12 = scmp.ne.s32.totalorder %s119_s30, %s423_s22  ;;  %s427_s24 = sshll.u32 %s521_s23, 4  ;;  %s428_s24 = int_to_ptr.vmem [resolvable:$false] %s427_s24 }
  0x32   : > { %s429_s26 = scalar_lea.vmem %s428_s24, 224  ;;  %p430_p11 = scmp.lt.s32.totalorder %s119_s30, %s428_s24 }
  0x33   : > { %p425_p1 = pnand %p424_p12, %p338_p0  ;;  %p431_p9 = scmp.lt.s32.totalorder %s429_s26, %s423_s22 }
  0x35   : > { %p426_p2 = pneg %p425_p1  ;;  %p432_p8 = por %p431_p9, %p430_p11 }
  0x37   : > { %p433_p4 = pnand %p432_p8, %p426_p2 }
  0x39   : > { %436 = shalt.err (!%p433_p4)
}
  0x3a   : > { %121 = dma.hbm_to_vmem [thread:$0]  (%p338_p0), %s608_s4, %s597_s25, %s119_s30, %s600_s27  }
  0x3b PF: > { %p340_p12 = scmp.ge.s32.totalorder %s519_s11, 1  ;;  %p123_p3 = scmp.lt.s32.totalorder %s519_s11, 3 }
  0x3d   : > { %p124_p5 = pnand %p340_p12, %p123_p3 }
  0x3e   : > { %s634_s28 = sand.u32 (!%p124_p5), 1, %s503_s7   ;;  %p711_p8 = scmp.ne.s32.totalorder (!%p124_p5), %s708_s17, 0 }
  0x3f   : > { %127 = sbr.rel (%p124_p5) target bundleno = 114 (0x72), region = 24  ;;  %s130_s2 = scalar_lea.sflag (!%p124_p5), [#allocation3], %s634_s28 }
  0x40   : > { %s351_s29 = smul.u32 (!%p124_p5), 7, %s634_s28 }
  0x42   : > { %s133_s3 = scalar_lea.vmem (!%p124_p5), [#allocation2], %s351_s29 }
  0x46   : > { %490 = dma.done.wait (%p711_p8), %s130_s2, 112  }
  0x47   : > { %492 = vsyncadd (%p711_p8), %s130_s2, 4294967184  ;;  %v164_v0 = vlaneseq  ;;  %v522_v1 = vmov 1983009808   ;;  %v162_v12 = vld [vmem:[%s133_s3] sm:$0xff]  ;;  %s352_s17 = smul.u32 14, %s634_s28  ;;  %s230_s27 = scalar_lea.sflag [#allocation4], %s634_s28 }
  0x48   : > { %v195_v2 = vunpack.c.l.s4 %v522_v1  ;;  %p712_p9 = scmp.ne.s32.totalorder %s709_s18, 0 }
  0x49   : > { %v165_v3 = vshrl.u32 %v164_v0, 7  ;;  %s151_s25 = scalar_lea.vmem [#allocation5], %s352_s17  ;;  %s237_s30 = smul.u32 (%p712_p9), 7, %s511_s9 }
  0x4a   : > { %v196_v4 = vunpack.c.0.s8 %v195_v2 }
  0x4b   : > { %v166_v5 = vsub.s32 0, %v165_v3  ;;  %v170_v6 = vsub.s32 1, %v165_v3  ;;  %v174_v7 = vsub.s32 2, %v165_v3  ;;  %v178_v8 = vsub.s32 3, %v165_v3  ;;  %s238_s4 = ssub.s32 (%p712_p9), 13, %s237_s30 }
  0x4c   : > { %v182_v9 = vsub.s32 4, %v165_v3  ;;  %v186_v10 = vsub.s32 5, %v165_v3  ;;  %v190_v11 = vsub.s32 6, %v165_v3  ;;  %v199_v13 = vsub.s32 %v196_v4, %v165_v3  ;;  %p239_p11 = scmp.lt.s32.totalorder (%p712_p9), %s238_s4, 7 }
  0x4d   : > { %v167_v14 = vrot.slane %v162_v12, %v166_v5  ;;  %v171_v15 = vrot.slane %v162_v12, %v170_v6  ;;  %v175_v16 = vrot.slane %v162_v12, %v174_v7  ;;  %v179_v17 = vrot.slane %v162_v12, %v178_v8 }
  0x4e   : > { %v183_v18 = vrot.slane %v162_v12, %v182_v9  ;;  %v187_v19 = vrot.slane %v162_v12, %v186_v10  ;;  %v191_v20 = vrot.slane %v162_v12, %v190_v11 }
  0x4f   : > { %v192_v21 = vcombine.low %v167_v14, %v171_v15  ;;  %v193_v22 = vcombine.low %v175_v16, %v179_v17 }
  0x50   : > { %v209_v23 = vcombine.low %v183_v18, %v187_v19  ;;  %v223_v24 = vrot.slane %v191_v20, %v199_v13  ;;  %236 = sbr.rel (!%p712_p9) target bundleno = 114 (0x72), region = 32 }
  0x51   : > { %v200_v25 = vrot.slane %v192_v21, %v199_v13  ;;  %v207_v26 = vrot.slane %v193_v22, %v199_v13 }
  0x52   : > { %v216_v27 = vrot.slane %v209_v23, %v199_v13 }
  0x53   : > { %v208_v28 = vcombine.low %v200_v25, %v207_v26 }
  0x54   : > { %v224_v29 = vcombine.low %v216_v27, %v223_v24 }
  0x55   : > { %227 = vst [vmem:[%s151_s25] sm:$0xff] %v208_v28 }
  0x56   : > { %228 = vst [vmem:[%s151_s25 + $0x8] sm:$0x3f] %v224_v29 }
  0x57   : > { %s725_s4 = smov (!%p239_p11, %s238_s4), 7 }
  0x58   : > { %s647_s5 = sshll.u32 %s725_s4, 5 }
  0x59   : > { %s243_s12 = ssub.s32 224, %s647_s5 }
  0x5a   : > { %244 = vsyncadd %s230_s27, %s243_s12  ;;  %p342_p0 = scmp.ne.s32.totalorder %s647_s5, 0  ;;  %s349_s13 = smul.u32 224, %s511_s9 }
  0x5b   : > { %s252_s18 = sshll.u32 %s151_s25, 4  ;;  %s523_s23 = smov [#allocation5]   ;;  %s253_s18 = int_to_ptr.vmem [resolvable:$true] %s252_s18 }
  0x5c   : > { %s657_s21 = scalar_lea.hbm %s705_s1, %s349_s13  ;;  %s437_s22 = scalar_lea.vmem %s253_s18, %s647_s5 }
  0x5d   : > { %p438_p6 = scmp.ne.s32.totalorder %s253_s18, %s437_s22  ;;  %s441_s24 = sshll.u32 %s523_s23, 4  ;;  %s442_s24 = int_to_ptr.vmem [resolvable:$false] %s441_s24 }
  0x5e   : > { %s443_s26 = scalar_lea.vmem %s442_s24, 448  ;;  %p444_p13 = scmp.lt.s32.totalorder %s253_s18, %s442_s24 }
  0x5f   : > { %p439_p7 = pnand %p438_p6, %p342_p0  ;;  %p445_p1 = scmp.lt.s32.totalorder %s443_s26, %s437_s22 }
  0x61   : > { %p440_p10 = pneg %p439_p7  ;;  %p446_p2 = por %p445_p1, %p444_p13 }
  0x63   : > { %p447_p4 = pnand %p446_p2, %p440_p10 }
  0x65   : > { %450 = shalt.err (!%p447_p4)
}
  0x66   : > { %s451_s9 = scalar_lea.hbm %s657_s21, %s647_s5  ;;  %s455_s3 = scalar_lea.hbm %s705_s1, 416 }
  0x67   : > { %p452_p12 = scmp.ne.s32.totalorder %s657_s21, %s451_s9  ;;  %p456_p8 = scmp.lt.u32.totalorder %s657_s21, %s705_s1 }
  0x68   : > { %p457_p9 = scmp.lt.u32.totalorder %s455_s3, %s451_s9  ;;  %p459_p6 = scmp.lt.u32.totalorder %s451_s9, %s657_s21 }
  0x69   : > { %p453_p3 = pnand %p452_p12, %p342_p0 }
  0x6a   : > { %p458_p11 = por %p457_p9, %p456_p8 }
  0x6b   : > { %p454_p5 = pneg %p453_p3 }
  0x6c   : > { %p460_p7 = por %p459_p6, %p458_p11 }
  0x6e   : > { %p461_p10 = pnand %p460_p7, %p454_p5 }
  0x70   : > { %464 = shalt.err (!%p461_p10)
}
  0x71   : > { %255 = dma.vmem_to_hbm [thread:$0]  (%p342_p0), %s253_s18, %s647_s5, %s657_s21, %s230_s27  }
  0x72 PF: > { %s264_s30 = sand.u32 1, %s499_s6   ;;  %p713_p13 = scmp.ne.s32.totalorder %s710_s20, 0 }
  0x73   : > { %p714_p1 = scmp.ge.s32.totalorder %s519_s11, 2  ;;  %s265_s4 = scalar_lea.sflag [#allocation4], %s264_s30 }
  0x75   : > { %p356_p2 = pnand %p714_p1, %p713_p13 }
  0x77   : > { %494 = dma.done.wait (!%p356_p2), %s265_s4, 224  }
  0x78   : > { %496 = vsyncadd (!%p356_p2), %s265_s4, 4294967072  ;;  %s17_s11 = sadd.s32 1, %s519_s11   ;;  %s715_s6 = smov %s503_s7 }
  0x79   : > { %p14_p4 = scmp.ge.s32.totalorder %s17_s11, 4   ;;  %s716_s7 = smov %s507_s8 }
  0x7a   : > { %s717_s8 = smov %s586_s19  ;;  %s718_s9 = smov %s515_s10 }
  0x7b   : > { %s719_s10 = smov %s721_s14  ;;  %16 = sbr.rel (!%p14_p4) target bundleno = 6 (0x6), region = 69 }
  0x82   :  { %270 = vsyncpa [#allocation3], 1 }
  0x83   :  { %272 = vsyncpa [#allocation3 + $0x1], 1 }
  0x84   :  { %273 = vsyncpa [#allocation4], 1 }
  0x85   :  { %275 = vsyncpa [#allocation4 + $0x1], 1 }

</bundles_post_ra>
